<compile_context>
chip_gen: v5e
topology: v5e:2x2
jax: 0.10.0
libtpu: 0.0.40
codegen_flags: <defaults>
</compile_context>

<pallas_src>
import jax
import jax.numpy as jnp
from jax.experimental import pallas as pl
from jax.experimental.pallas import tpu as pltpu


# ---------------------------------------------------------------------------
# Kernel bodies
# ---------------------------------------------------------------------------
def _finalize(h_f32, b1_ref, w2_ref, b2_ref, o_ref, *, num_answer):
    """bias + ReLU + folded LayerNorm + second linear; writes o_ref."""
    h = jnp.maximum(h_f32 + b1_ref[...].astype(jnp.float32), 0.0)
    w2 = w2_ref[...]
    # One MXU pass: columns [:A] = (h - u) @ W2'  (mean-centered folded weights),
    # column [A] = row mean u (ones/H2 column).
    hw = jnp.dot(h.astype(w2.dtype), w2, preferred_element_type=jnp.float32)
    u = hw[:, num_answer:]                       # (tm, 1)
    centered = hw[:, :num_answer]                # (tm, A)
    # One-pass variance: E[h^2] - u^2 (single cross-lane reduce, f32).
    msq = jnp.mean(h * h, axis=-1, keepdims=True)
    var = jnp.maximum(msq - u * u, 0.0)
    inv = jax.lax.rsqrt(var + 1e-12)
    # Dropout: eval-mode identity.
    # TODO(synk): training-mode dropout (pltpu.prng_random_bits mask) not emitted.
    out = centered * inv + b2_ref[...].astype(jnp.float32)
    o_ref[...] = out.astype(o_ref.dtype)


def _make_fused_kernel(num_answer):
    def kernel(x_ref, w1_ref, b1_ref, w2_ref, b2_ref, o_ref):
        h = jnp.dot(x_ref[...], w1_ref[...], preferred_element_type=jnp.float32)
        _finalize(h, b1_ref, w2_ref, b2_ref, o_ref, num_answer=num_answer)
    return kernel


def _make_ktiled_kernel(num_answer):
    def kernel(x_ref, w1_ref, b1_ref, w2_ref, b2_ref, o_ref, h_acc):
        k = pl.program_id(1)

        @pl.when(k == 0)
        def _():
            h_acc[...] = jnp.zeros_like(h_acc)

        h_acc[...] += jnp.dot(x_ref[...], w1_ref[...],
                              preferred_element_type=jnp.float32)

        @pl.when(k == pl.num_programs(1) - 1)
        def _():
            _finalize(h_acc[...], b1_ref, w2_ref, b2_ref, o_ref,
                      num_answer=num_answer)
    return kernel


# ---------------------------------------------------------------------------
# Wrapper
# ---------------------------------------------------------------------------
def _vmem_capacity_bytes():
    try:
        return int(pltpu.get_tpu_info().vmem_capacity_bytes)
    except Exception:
        return 128 * 1024 * 1024


def _round_up(v, m):
    return (v + m - 1) // m * m


def output_layer(hidden_states, w1, b1, gamma, beta, w2, b2, *, tm=None):
    B, S, H = hidden_states.shape
    H2 = w1.shape[1]
    A = w2.shape[1]
    M = B * S
    x = hidden_states.reshape(M, H)
    f32 = jnp.float32

    # ---- Fold LayerNorm through the second linear (wrapper-side, once). ----
    #   LN(h) @ W2 + b2
    #     = rsqrt(var+eps) * ((h - u) @ (gamma[:,None] * W2)) + (beta @ W2 + b2)
    #     = rsqrt(var+eps) * (h @ W2c) + b2'
    # where W2' = gamma[:,None] * W2, W2c = W2' - colmean(W2'), b2' = beta@W2 + b2.
    w2_f32 = w2.astype(f32)
    w2_fold = gamma.astype(f32)[:, None] * w2_f32                  # (H2, A)
    b2_fold = beta.astype(f32) @ w2_f32 + b2.astype(f32)           # (A,)
    w2_cent = w2_fold - jnp.mean(w2_fold, axis=0, keepdims=True)   # mean fold
    mean_col = jnp.full((H2, 1), 1.0 / H2, dtype=f32)              # u via MXU
    w2_aug = jnp.concatenate([w2_cent, mean_col], axis=1).astype(w1.dtype)

    b1_2d = b1.reshape(1, H2)
    b2_2d = b2_fold.reshape(1, A)

    # ---- Generation-aware tiling. ----
    vmem_cap = _vmem_capacity_bytes()
    vmem_limit = int(vmem_cap * 3 // 4)          # ~96 MiB on v5e/v6e, ~48 MiB on v7x
    if tm is None:
        tm = 512 if vmem_cap >= (96 << 20) else 256

    if M <= 8:
        blk_m = M
    elif M <= tm:
        # Keep >= 2 grid steps so both v7x TensorCores get work.
        blk_m = max(8, _round_up(pl.cdiv(M, 2), 8))
    else:
        blk_m = tm

    # K-tiled fallback when W1 (+ intermediates) would not comfortably fit VMEM.
    itemsize_w = jnp.dtype(w1.dtype).itemsize
    resident_bytes = H * H2 * itemsize_w + H2 * (A + 1) * itemsize_w
    per_step_bytes = (2 * blk_m * H * jnp.dtype(x.dtype).itemsize
                      + 2 * blk_m * H2 * 4
                      + 2 * blk_m * max(A, 8) * 4)
    use_ktile = (resident_bytes + per_step_bytes) > int(0.7 * vmem_limit)
    tk = None
    if use_ktile:
        for cand in (1024, 512, 256, 128):
            if H % cand == 0:
                tk = cand
                break
        if tk is None or tk >= H:
            use_ktile = False

    out_shape = jax.ShapeDtypeStruct((M, A), hidden_states.dtype)

    def _run(single_buffer_weights):
        def resident(shape, index_map):
            # Constant index_map: never re-fetched -> single buffer saves VMEM.
            if single_buffer_weights:
                return pl.BlockSpec(shape, index_map,
                                    pipeline_mode=pl.Buffered(1))
            return pl.BlockSpec(shape, index_map)

        if not use_ktile:
            grid = (pl.cdiv(M, blk_m),)
            in_specs = [
                pl.BlockSpec((blk_m, H), lambda i: (i, 0)),    # x rows (pipelined)
                resident((H, H2), lambda i: (0, 0)),           # W1 (resident)
                resident((1, H2), lambda i: (0, 0)),           # b1 (resident)
                resident((H2, A + 1), lambda i: (0, 0)),       # folded/aug W2
                resident((1, A), lambda i: (0, 0)),            # folded b2
            ]
            out_specs = pl.BlockSpec((blk_m, A), lambda i: (i, 0))
            scratch = []
            kernel = _make_fused_kernel(A)
            dims = ("parallel",)
        else:
            grid = (pl.cdiv(M, blk_m), H // tk)
            in_specs = [
                pl.BlockSpec((blk_m, tk), lambda i, k: (i, k)),  # x (pipelined)
                pl.BlockSpec((tk, H2), lambda i, k: (k, 0)),     # W1 K-slices
                resident((1, H2), lambda i, k: (0, 0)),
                resident((H2, A + 1), lambda i, k: (0, 0)),
                resident((1, A), lambda i, k: (0, 0)),
            ]
            out_specs = pl.BlockSpec((blk_m, A), lambda i, k: (i, 0))
            scratch = [pltpu.VMEM((blk_m, H2), jnp.float32)]
            kernel = _make_ktiled_kernel(A)
            dims = ("parallel", "arbitrary")

        return pl.pallas_call(
            kernel,
            out_shape=out_shape,
            grid_spec=pltpu.PrefetchScalarGridSpec(
                num_scalar_prefetch=0,
                grid=grid,
                in_specs=in_specs,
                out_specs=out_specs,
                scratch_shapes=scratch),
            compiler_params=pltpu.CompilerParams(
                dimension_semantics=dims,
                vmem_limit_bytes=vmem_limit),
        )(x, w1, b1_2d, w2_aug, b2_2d)

    try:
        out = _run(True)
    except Exception:
        # Older Pallas without BlockSpec(pipeline_mode=pl.Buffered(1)):
        # fall back to default double-buffered resident weights.
        out = _run(False)

    return out.reshape(B, S, A)


# ---------------------------------------------------------------------------
# Reference (pure JAX, mirrors the PyTorch module) + test
# ---------------------------------------------------------------------------
def reference(hidden_states, w1, b1, gamma, beta, w2, b2):
    h = jnp.einsum("bsh,hd->bsd", hidden_states, w1) + b1
    h = jnp.maximum(h, 0.0)
    u = jnp.mean(h, axis=-1, keepdims=True)
    s = jnp.mean((h - u) ** 2, axis=-1, keepdims=True)
    h = (h - u) / jnp.sqrt(s + 1e-12)
    h = gamma * h + beta
    return jnp.einsum("bsd,da->bsa", h, w2) + b2


if __name__ == "__main__":
    key = jax.random.PRNGKey(0)
    B, S, H = 2, 8, 32
    H2 = H * 2          # hidden_dim * 2

    for A in (1, 4):    # num_answer=1 (module default) and a wider head
        keys = jax.random.split(jax.random.fold_in(key, A), 7)
        k_x, k_w1, k_b1, k_g, k_be, k_w2, k_b2 = keys

        hidden_states = jax.random.normal(k_x, (B, S, H), dtype=jnp.float32)
        w1 = jax.random.normal(k_w1, (H, H2), dtype=jnp.float32) * 0.05
        b1 = jax.random.normal(k_b1, (H2,), dtype=jnp.float32) * 0.05
        gamma = 1.0 + 0.1 * jax.random.normal(k_g, (H2,), dtype=jnp.float32)
        beta = 0.1 * jax.random.normal(k_be, (H2,), dtype=jnp.float32)
        w2 = jax.random.normal(k_w2, (H2, A), dtype=jnp.float32) * 0.05
        b2 = jax.random.normal(k_b2, (A,), dtype=jnp.float32) * 0.05

        out = jax.block_until_ready(
            output_layer(hidden_states, w1, b1, gamma, beta, w2, b2))
        ref = reference(hidden_states, w1, b1, gamma, beta, w2, b2)

        assert out.shape == (B, S, A), out.shape
        err = float(jnp.max(jnp.abs(out - ref)))
        assert err < 1e-4, err

    print("KERNEL_OK")
</pallas_src>

<mosaic_0001>
module attributes {stable_mosaic.version = 11 : i64} {
  func.func @kernel(%arg0: i32, %arg1: memref<8x32xf32, #tpu.memory_space<vmem>>, %arg2: memref<32x64xf32, #tpu.memory_space<vmem>>, %arg3: memref<1x64xf32, #tpu.memory_space<vmem>>, %arg4: memref<64x2xf32, #tpu.memory_space<vmem>>, %arg5: memref<1x1xf32, #tpu.memory_space<vmem>>, %arg6: memref<8x1xf32, #tpu.memory_space<vmem>>) attributes {dimension_semantics = [#tpu.dimension_semantics<parallel>], iteration_bounds = array<i64: 2>, scalar_prefetch = 0 : i64, scratch_operands = 0 : i64, tpu.core_type = #tpu.core_type<tc>, window_params = [{transform_indices = @transform_0, window_bounds = array<i64: 8, 32>}, {pipeline_mode = #tpu.pipeline_mode<synchronous>, transform_indices = @transform_1, window_bounds = array<i64: 32, 64>}, {pipeline_mode = #tpu.pipeline_mode<synchronous>, transform_indices = @transform_2, window_bounds = array<i64: 1, 64>}, {pipeline_mode = #tpu.pipeline_mode<synchronous>, transform_indices = @transform_3, window_bounds = array<i64: 64, 2>}, {pipeline_mode = #tpu.pipeline_mode<synchronous>, transform_indices = @transform_4, window_bounds = array<i64: 1, 1>}, {transform_indices = @transform_5, window_bounds = array<i64: 8, 1>}]} {
    %c0 = arith.constant 0 : index
    %c0_0 = arith.constant 0 : index
    %0 = vector.load %arg1[%c0, %c0_0] : memref<8x32xf32, #tpu.memory_space<vmem>>, vector<8x32xf32>
    %c0_1 = arith.constant 0 : index
    %c0_2 = arith.constant 0 : index
    %1 = vector.load %arg2[%c0_1, %c0_2] : memref<32x64xf32, #tpu.memory_space<vmem>>, vector<32x64xf32>
    %cst = arith.constant dense<0.000000e+00> : vector<8x64xf32>
    %2 = tpu.matmul %0, %1, %cst {dimension_numbers = #tpu.dot_dimension_numbers<[1], [0], [0], [1], [0, 0, 1, 1], [], []>} : vector<8x32xf32>, vector<32x64xf32>, vector<8x64xf32> -> vector<8x64xf32>
    %c0_3 = arith.constant 0 : index
    %c0_4 = arith.constant 0 : index
    %3 = vector.load %arg3[%c0_3, %c0_4] : memref<1x64xf32, #tpu.memory_space<vmem>>, vector<1x64xf32>
    %4 = vector.broadcast %3 : vector<1x64xf32> to vector<8x64xf32>
    %5 = arith.addf %2, %4 : vector<8x64xf32>
    %cst_5 = arith.constant 0.000000e+00 : f32
    %6 = vector.broadcast %cst_5 : f32 to vector<8x64xf32>
    %7 = arith.maximumf %5, %6 : vector<8x64xf32>
    %c0_6 = arith.constant 0 : index
    %c0_7 = arith.constant 0 : index
    %8 = vector.load %arg4[%c0_6, %c0_7] : memref<64x2xf32, #tpu.memory_space<vmem>>, vector<64x2xf32>
    %cst_8 = arith.constant dense<0.000000e+00> : vector<8x2xf32>
    %9 = tpu.matmul %7, %8, %cst_8 {dimension_numbers = #tpu.dot_dimension_numbers<[1], [0], [0], [1], [0, 0, 1, 1], [], []>} : vector<8x64xf32>, vector<64x2xf32>, vector<8x2xf32> -> vector<8x2xf32>
    %10 = vector.extract_strided_slice %9 {offsets = [0, 1], sizes = [8, 1], strides = [1, 1]} : vector<8x2xf32> to vector<8x1xf32>
    %11 = vector.extract_strided_slice %9 {offsets = [0, 0], sizes = [8, 1], strides = [1, 1]} : vector<8x2xf32> to vector<8x1xf32>
    %12 = arith.mulf %7, %7 : vector<8x64xf32>
    %cst_9 = arith.constant dense<0.000000e+00> : vector<8xf32>
    %13 = vector.multi_reduction <add>, %12, %cst_9 [1] : vector<8x64xf32> to vector<8xf32>
    %14 = vector.shape_cast %13 : vector<8xf32> to vector<8x1xf32>
    %cst_10 = arith.constant 6.400000e+01 : f32
    %15 = vector.broadcast %cst_10 : f32 to vector<8x1xf32>
    %16 = arith.divf %14, %15 : vector<8x1xf32>
    %17 = arith.mulf %10, %10 : vector<8x1xf32>
    %18 = arith.subf %16, %17 : vector<8x1xf32>
    %cst_11 = arith.constant 0.000000e+00 : f32
    %19 = vector.broadcast %cst_11 : f32 to vector<8x1xf32>
    %20 = arith.maximumf %18, %19 : vector<8x1xf32>
    %cst_12 = arith.constant 9.99999996E-13 : f32
    %21 = vector.broadcast %cst_12 : f32 to vector<8x1xf32>
    %22 = arith.addf %20, %21 : vector<8x1xf32>
    %23 = math.rsqrt %22 : vector<8x1xf32>
    %24 = arith.mulf %11, %23 : vector<8x1xf32>
    %c0_13 = arith.constant 0 : index
    %c0_14 = arith.constant 0 : index
    %25 = vector.load %arg5[%c0_13, %c0_14] : memref<1x1xf32, #tpu.memory_space<vmem>>, vector<1x1xf32>
    %26 = vector.broadcast %25 : vector<1x1xf32> to vector<8x1xf32>
    %27 = arith.addf %24, %26 : vector<8x1xf32>
    %c0_15 = arith.constant 0 : index
    %c0_16 = arith.constant 0 : index
    %28 = vector.load %arg6[%c0_15, %c0_16] : memref<8x1xf32, #tpu.memory_space<vmem>>, vector<8x1xf32>
    tpu.vector_store %arg6[%c0_15, %c0_16], %27 {strides = array<i32>} : memref<8x1xf32, #tpu.memory_space<vmem>>, vector<8x1xf32>,
    return
  }
  func.func @transform_0(%arg0: i32) -> (i32, i32) {
    %c0_i32 = arith.constant 0 : i32
    %c0_i32_0 = arith.constant 0 : i32
    return %arg0, %c0_i32 : i32, i32
  }
  func.func @transform_1(%arg0: i32) -> (i32, i32) {
    %c0_i32 = arith.constant 0 : i32
    %c0_i32_0 = arith.constant 0 : i32
    %c0_i32_1 = arith.constant 0 : i32
    return %c0_i32, %c0_i32_0 : i32, i32
  }
  func.func @transform_2(%arg0: i32) -> (i32, i32) {
    %c0_i32 = arith.constant 0 : i32
    %c0_i32_0 = arith.constant 0 : i32
    %c0_i32_1 = arith.constant 0 : i32
    return %c0_i32, %c0_i32_0 : i32, i32
  }
  func.func @transform_3(%arg0: i32) -> (i32, i32) {
    %c0_i32 = arith.constant 0 : i32
    %c0_i32_0 = arith.constant 0 : i32
    %c0_i32_1 = arith.constant 0 : i32
    return %c0_i32, %c0_i32_0 : i32, i32
  }
  func.func @transform_4(%arg0: i32) -> (i32, i32) {
    %c0_i32 = arith.constant 0 : i32
    %c0_i32_0 = arith.constant 0 : i32
    %c0_i32_1 = arith.constant 0 : i32
    return %c0_i32, %c0_i32_0 : i32, i32
  }
  func.func @transform_5(%arg0: i32) -> (i32, i32) {
    %c0_i32 = arith.constant 0 : i32
    %c0_i32_0 = arith.constant 0 : i32
    return %arg0, %c0_i32 : i32, i32
  }
}

module attributes {stable_mosaic.version = 11 : i64} {
  func.func @kernel(%arg0: i32, %arg1: memref<8x32xf32, #tpu.memory_space<vmem>>, %arg2: memref<32x64xf32, #tpu.memory_space<vmem>>, %arg3: memref<1x64xf32, #tpu.memory_space<vmem>>, %arg4: memref<64x2xf32, #tpu.memory_space<vmem>>, %arg5: memref<1x1xf32, #tpu.memory_space<vmem>>, %arg6: memref<8x1xf32, #tpu.memory_space<vmem>>) attributes {dimension_semantics = [#tpu.dimension_semantics<parallel>], iteration_bounds = array<i64: 2>, scalar_prefetch = 0 : i64, scratch_operands = 0 : i64, tpu.core_type = #tpu.core_type<tc>, window_params = [{transform_indices = @transform_0, window_bounds = array<i64: 8, 32>}, {pipeline_mode = #tpu.pipeline_mode<synchronous>, transform_indices = @transform_1, window_bounds = array<i64: 32, 64>}, {pipeline_mode = #tpu.pipeline_mode<synchronous>, transform_indices = @transform_2, window_bounds = array<i64: 1, 64>}, {pipeline_mode = #tpu.pipeline_mode<synchronous>, transform_indices = @transform_3, window_bounds = array<i64: 64, 2>}, {pipeline_mode = #tpu.pipeline_mode<synchronous>, transform_indices = @transform_4, window_bounds = array<i64: 1, 1>}, {transform_indices = @transform_5, window_bounds = array<i64: 8, 1>}]} {
    %c0 = arith.constant 0 : index
    %c0_0 = arith.constant 0 : index
    %0 = vector.load %arg1[%c0, %c0_0] : memref<8x32xf32, #tpu.memory_space<vmem>>, vector<8x32xf32>
    %c0_1 = arith.constant 0 : index
    %c0_2 = arith.constant 0 : index
    %1 = vector.load %arg2[%c0_1, %c0_2] : memref<32x64xf32, #tpu.memory_space<vmem>>, vector<32x64xf32>
    %cst = arith.constant dense<0.000000e+00> : vector<8x64xf32>
    %2 = tpu.matmul %0, %1, %cst {dimension_numbers = #tpu.dot_dimension_numbers<[1], [0], [0], [1], [0, 0, 1, 1], [], []>} : vector<8x32xf32>, vector<32x64xf32>, vector<8x64xf32> -> vector<8x64xf32>
    %c0_3 = arith.constant 0 : index
    %c0_4 = arith.constant 0 : index
    %3 = vector.load %arg3[%c0_3, %c0_4] : memref<1x64xf32, #tpu.memory_space<vmem>>, vector<1x64xf32>
    %4 = vector.broadcast %3 : vector<1x64xf32> to vector<8x64xf32>
    %5 = arith.addf %2, %4 : vector<8x64xf32>
    %cst_5 = arith.constant 0.000000e+00 : f32
    %6 = vector.broadcast %cst_5 : f32 to vector<8x64xf32>
    %7 = arith.maximumf %5, %6 : vector<8x64xf32>
    %c0_6 = arith.constant 0 : index
    %c0_7 = arith.constant 0 : index
    %8 = vector.load %arg4[%c0_6, %c0_7] : memref<64x2xf32, #tpu.memory_space<vmem>>, vector<64x2xf32>
    %cst_8 = arith.constant dense<0.000000e+00> : vector<8x2xf32>
    %9 = tpu.matmul %7, %8, %cst_8 {dimension_numbers = #tpu.dot_dimension_numbers<[1], [0], [0], [1], [0, 0, 1, 1], [], []>} : vector<8x64xf32>, vector<64x2xf32>, vector<8x2xf32> -> vector<8x2xf32>
    %10 = vector.extract_strided_slice %9 {offsets = [0, 1], sizes = [8, 1], strides = [1, 1]} : vector<8x2xf32> to vector<8x1xf32>
    %11 = vector.extract_strided_slice %9 {offsets = [0, 0], sizes = [8, 1], strides = [1, 1]} : vector<8x2xf32> to vector<8x1xf32>
    %12 = arith.mulf %7, %7 : vector<8x64xf32>
    %cst_9 = arith.constant dense<0.000000e+00> : vector<8xf32>
    %13 = vector.multi_reduction <add>, %12, %cst_9 [1] : vector<8x64xf32> to vector<8xf32>
    %14 = vector.shape_cast %13 : vector<8xf32> to vector<8x1xf32>
    %cst_10 = arith.constant 6.400000e+01 : f32
    %15 = vector.broadcast %cst_10 : f32 to vector<8x1xf32>
    %16 = arith.divf %14, %15 : vector<8x1xf32>
    %17 = arith.mulf %10, %10 : vector<8x1xf32>
    %18 = arith.subf %16, %17 : vector<8x1xf32>
    %cst_11 = arith.constant 0.000000e+00 : f32
    %19 = vector.broadcast %cst_11 : f32 to vector<8x1xf32>
    %20 = arith.maximumf %18, %19 : vector<8x1xf32>
    %cst_12 = arith.constant 9.99999996E-13 : f32
    %21 = vector.broadcast %cst_12 : f32 to vector<8x1xf32>
    %22 = arith.addf %20, %21 : vector<8x1xf32>
    %23 = math.rsqrt %22 : vector<8x1xf32>
    %24 = arith.mulf %11, %23 : vector<8x1xf32>
    %c0_13 = arith.constant 0 : index
    %c0_14 = arith.constant 0 : index
    %25 = vector.load %arg5[%c0_13, %c0_14] : memref<1x1xf32, #tpu.memory_space<vmem>>, vector<1x1xf32>
    %26 = vector.broadcast %25 : vector<1x1xf32> to vector<8x1xf32>
    %27 = arith.addf %24, %26 : vector<8x1xf32>
    %c0_15 = arith.constant 0 : index
    %c0_16 = arith.constant 0 : index
    %28 = vector.load %arg6[%c0_15, %c0_16] : memref<8x1xf32, #tpu.memory_space<vmem>>, vector<8x1xf32>
    tpu.vector_store %arg6[%c0_15, %c0_16], %27 {strides = array<i32>} : memref<8x1xf32, #tpu.memory_space<vmem>>, vector<8x1xf32>,
    return
  }
  func.func @transform_0(%arg0: i32) -> (i32, i32) {
    %c0_i32 = arith.constant 0 : i32
    %c0_i32_0 = arith.constant 0 : i32
    return %arg0, %c0_i32 : i32, i32
  }
  func.func @transform_1(%arg0: i32) -> (i32, i32) {
    %c0_i32 = arith.constant 0 : i32
    %c0_i32_0 = arith.constant 0 : i32
    %c0_i32_1 = arith.constant 0 : i32
    return %c0_i32, %c0_i32_0 : i32, i32
  }
  func.func @transform_2(%arg0: i32) -> (i32, i32) {
    %c0_i32 = arith.constant 0 : i32
    %c0_i32_0 = arith.constant 0 : i32
    %c0_i32_1 = arith.constant 0 : i32
    return %c0_i32, %c0_i32_0 : i32, i32
  }
  func.func @transform_3(%arg0: i32) -> (i32, i32) {
    %c0_i32 = arith.constant 0 : i32
    %c0_i32_0 = arith.constant 0 : i32
    %c0_i32_1 = arith.constant 0 : i32
    return %c0_i32, %c0_i32_0 : i32, i32
  }
  func.func @transform_4(%arg0: i32) -> (i32, i32) {
    %c0_i32 = arith.constant 0 : i32
    %c0_i32_0 = arith.constant 0 : i32
    %c0_i32_1 = arith.constant 0 : i32
    return %c0_i32, %c0_i32_0 : i32, i32
  }
  func.func @transform_5(%arg0: i32) -> (i32, i32) {
    %c0_i32 = arith.constant 0 : i32
    %c0_i32_0 = arith.constant 0 : i32
    return %arg0, %c0_i32 : i32, i32
  }
}

</mosaic_0001>

<bundles_post_ra>
// kernel: tpu_custom_call.1
= control target key start
LH: loop header
LB: loop body
LE: loop exit
PB: predicated region body
PF: predicated region fallthrough
CT: control target
= control target key end

     0   :  { %s449_s20 = smov 0   ;;  %s512_s0 = inlined_call_operand.vmem [shape: f32[16,32], index: 0, kind: input, shape index: {}]   ;;  %s513_s1 = inlined_call_operand.vmem [shape: f32[32,64], index: 1, kind: input, shape index: {}]   ;;  %s514_s2 = inlined_call_operand.vmem [shape: f32[1,64], index: 2, kind: input, shape index: {}]   ;;  %s515_s3 = inlined_call_operand.vmem [shape: f32[64,2], index: 3, kind: input, shape index: {}]   ;;  %s516_s4 = inlined_call_operand.<no memory space> [shape: f32[1,1], index: 4, kind: input, shape index: {}]   ;;  %s517_s5 = inlined_call_operand.vmem [shape: f32[16,1], index: 5, kind: output, shape index: {}]  }
   0x1   :  { %v10_v0 = vstv %s516_s4 }
   0x2   :  { %11 = vst [vmem:[#allocation2] sm:$0x1] %v10_v0 }
   0x3 LB: > { %s379_s21 = sadd.s32 4294967295, %s412_s20   ;;  %p383_p0 = scmp.ge.s32.totalorder %s412_s20, 1  ;;  %s412_s20 = sphi %s449_s20, %s17_s20  }
   0x4   : > { %p188_p1 = scmp.lt.s32.totalorder %s412_s20, 3 }
   0x6   : > { %p189_p2 = pnand %p383_p0, %p188_p1 }
   0x7   : > { %p214_p3 = scmp.lt.s32.totalorder (!%p189_p2), %s379_s21, 1  ;;  %s415_s27 = smov (!%p189_p2), 127  }
   0x8   : > { %192 = sbr.rel (%p189_p2) target bundleno = 423 (0x1a7), region = 40 }
   0xd   : > { %v226_v1 = vld [vmem:[%s513_s1 + $0x18] sm:$0xff]  ;;  %v225_v2 = vld [vmem:[%s513_s1 + $0x10] sm:$0xff]  ;;  %v224_v5 = vld [vmem:[%s513_s1 + $0x8] sm:$0xff]  ;;  %s519_s21 = smov (!%p214_p3, %s379_s21), 1  ;;  %vm231_vm0 = vcmask 261120   ;;  %vm264_vm1 = vcmask 523264  }
   0xe   : > { %247 = vmatpush.msra.mxu0 %v226_v1  ;;  %v263_v3 = vld [vmem:[%s515_s3 + $0x38] sm:$0xff]  ;;  %v262_v4 = vld [vmem:[%s515_s3 + $0x30] sm:$0xff]  ;;  %v261_v6 = vld [vmem:[%s515_s3 + $0x28] sm:$0xff]  ;;  %s384_s10 = sshll.u32 %s519_s21, 3  ;;  %v414_v20 = vmov 64.0   ;;  %vm324_vm6 = vcmask 7168  }
   0xf   : > { %276 = vmatpush.msra.mxu1 %v263_v3  ;;  %v223_v7 = vld [vmem:[%s513_s1] sm:$0xff]  ;;  %s217_s13 = scalar_lea.vmem %s512_s0, %s384_s10  ;;  %v259_v10 = vld [vmem:[%s515_s3 + $0x18] sm:$0xff]  ;;  %v258_v11 = vld [vmem:[%s515_s3 + $0x10] sm:$0xff]  ;;  %402 = vrcp.f32 %v414_v20  ;;  %s221_s30 = scalar_lea.vmem %s517_s5, %s384_s10 }
  0x10   : > { %248 = vmatpush.msra.mxu0 %v225_v2  ;;  %v260_v8 = vld [vmem:[%s515_s3 + $0x20] sm:$0xff]  ;;  %v257_v12 = vld [vmem:[%s515_s3 + $0x8] sm:$0xff] }
  0x11   : > { %277 = vmatpush.msra.mxu1 %v262_v4  ;;  %v222_v9 = vld [vmem:[%s217_s13] sm:$0xff] }
  0x12   : > { %249 = vmatpush.msra.mxu0 %v224_v5  ;;  %v256_v13 = vld [vmem:[%s515_s3] sm:$0xff] }
  0x13   : > { %278 = vmatpush.msra.mxu1 %v261_v6  ;;  %v400_v14 = vld [vmem:[%s514_s2] ss:$0 sm:$0xff] }
  0x14   : > { %250 = vmatpush.msra.mxu0 %v223_v7  ;;  %v401_v41 = vld [vmem:[#allocation2] ss:$0 sm:$0xff] }
  0x15   : > { %386 = vmatmul.msk.f32.vlgmr.msra.gmra.mxu0 %vm231_vm0, %v222_v9  ;;  %279 = vmatpush.msra.mxu1 %v260_v8  ;;  %v403_v21 = vpop.eup %402 }
  0x16   : > { %v293_v22 = vmul.f32 64.0, %v403_v21  ;;  %vm297_vm2 = vweird.f32 %v403_v21 }
  0x17   : > { %280 = vmatpush.msra.mxu1 %v259_v10 }
  0x18   : > { %v294_v23 = vsub.f32 1.0, %v293_v22 }
  0x19   : > { %281 = vmatpush.msra.mxu1 %v258_v11 }
  0x1a   : > { %v295_v24 = vmul.f32 %v403_v21, %v294_v23 }
  0x1b   : > { %282 = vmatpush.msra.mxu1 %v257_v12 }
  0x1c   : > { %v296_v25 = vadd.f32 %v403_v21, %v295_v24 }
  0x1d   : > { %283 = vmatpush.msra.mxu1 %v256_v13 }
  0x1e   : > { %v298_v26 = vsel %vm297_vm2, %v403_v21, %v296_v25 }
  0x92   : > { %v252_v15 = vpop.f32.mrf.mxu0 }
  0x93   : > { %v253_v16 = vadd.f32 %v400_v14, %v252_v15 }
  0x95   : > { %v255_v17 = vmax.f32 %v253_v16, 0.0 }
  0x97   : > { %387 = vmatmul.msk.f32.vlgmr.msra.gmra.mxu1 %vm264_vm1, %v255_v17  ;;  %v288_v18 = vmul.f32 %v255_v17, %v255_v17 }
  0x99   : > { %v289_v19 = vsel %vm264_vm1, %v288_v18, 0.0 }
  0x9a   : > { %290 = vadd.xlane.f32.xlu0 %v289_v19 }
 0x10d   : > { %v291_v27 = vpop.xlane.xlu0 %290 }
 0x10e   : > { %v299_v29 = vmul.f32 %v298_v26, %v291_v27 }
 0x114   : > { %v285_v28 = vpop.f32.mrf.mxu1 }
 0x115   : > { %v300_v30 = vmul.f32 %v285_v28, %v285_v28 }
 0x117   : > { %v301_v31 = vsub.f32 %v299_v29, %v300_v30 }
 0x119   : > { %v302_v32 = vmax.f32 %v301_v31, 0.0 }
 0x11b   : > { %v303_v33 = vadd.f32 1e-12, %v302_v32 }
 0x11d   : > { %404 = vrsqrt.f32 %v303_v33  ;;  %vm310_vm4 = vweird.f32 %v303_v33 }
 0x123   : > { %v405_v34 = vpop.eup %404 }
 0x124   : > { %v305_v35 = vmul.f32 %v405_v34, %v303_v33  ;;  %vm311_vm3 = vweird.f32 %v405_v34 }
 0x125   : > { %vm312_vm5 = vmor %vm310_vm4, %vm311_vm3 }
 0x126   : > { %v306_v36 = vmul.f32 %v405_v34, %v305_v35 }
 0x128   : > { %v307_v37 = vmul.f32 0.5, %v306_v36 }
 0x12a   : > { %v308_v38 = vsub.f32 1.5, %v307_v37 }
 0x12c   : > { %v309_v39 = vmul.f32 %v405_v34, %v308_v38 }
 0x12e   : > { %v313_v40 = vsel %vm312_vm5, %v405_v34, %v309_v39 }
 0x12f   : > { %315 = vrot.lane.b32.xlu0 %v313_v40, %s415_s27 }
 0x1a1   : > { %v316_v42 = vpop.permute.xlu0 %315 }
 0x1a2   : > { %v318_v43 = vmul.f32 %v316_v42, %v285_v28 }
 0x1a4   : > { %v323_v44 = vadd.f32 %v401_v41, %v318_v43 }
 0x1a6   : > { %325 = vst.msk [vmem:[%s221_s30] sm:$0xff] %vm324_vm6, %v323_v44 }
 0x1a7 PF: > { %s17_s20 = sadd.s32 1, %s412_s20  }
 0x1a8   : > { %p14_p4 = scmp.ge.s32.totalorder %s17_s20, 4  }
 0x1aa   :  { %16 = sbr.rel (!%p14_p4) target bundleno = 3 (0x3), region = 70 }

// kernel: tpu_custom_call.1
= control target key start
LH: loop header
LB: loop body
LE: loop exit
PB: predicated region body
PF: predicated region fallthrough
CT: control target
= control target key end

     0   :  { %s449_s20 = smov 0   ;;  %s512_s0 = inlined_call_operand.vmem [shape: f32[16,32], index: 0, kind: input, shape index: {}]   ;;  %s513_s1 = inlined_call_operand.vmem [shape: f32[32,64], index: 1, kind: input, shape index: {}]   ;;  %s514_s2 = inlined_call_operand.vmem [shape: f32[1,64], index: 2, kind: input, shape index: {}]   ;;  %s515_s3 = inlined_call_operand.vmem [shape: f32[64,2], index: 3, kind: input, shape index: {}]   ;;  %s516_s4 = inlined_call_operand.<no memory space> [shape: f32[1,1], index: 4, kind: input, shape index: {}]   ;;  %s517_s5 = inlined_call_operand.vmem [shape: f32[16,1], index: 5, kind: output, shape index: {}]  }
   0x1   :  { %v10_v0 = vstv %s516_s4 }
   0x2   :  { %11 = vst [vmem:[#allocation2] sm:$0x1] %v10_v0 }
   0x3 LB: > { %s379_s21 = sadd.s32 4294967295, %s412_s20   ;;  %p383_p0 = scmp.ge.s32.totalorder %s412_s20, 1  ;;  %s412_s20 = sphi %s449_s20, %s17_s20  }
   0x4   : > { %p188_p1 = scmp.lt.s32.totalorder %s412_s20, 3 }
   0x6   : > { %p189_p2 = pnand %p383_p0, %p188_p1 }
   0x7   : > { %p214_p3 = scmp.lt.s32.totalorder (!%p189_p2), %s379_s21, 1  ;;  %s415_s27 = smov (!%p189_p2), 127  }
   0x8   : > { %192 = sbr.rel (%p189_p2) target bundleno = 423 (0x1a7), region = 40 }
   0xd   : > { %v226_v1 = vld [vmem:[%s513_s1 + $0x18] sm:$0xff]  ;;  %v225_v2 = vld [vmem:[%s513_s1 + $0x10] sm:$0xff]  ;;  %v224_v5 = vld [vmem:[%s513_s1 + $0x8] sm:$0xff]  ;;  %s519_s21 = smov (!%p214_p3, %s379_s21), 1  ;;  %vm231_vm0 = vcmask 261120   ;;  %vm264_vm1 = vcmask 523264  }
   0xe   : > { %247 = vmatpush.msra.mxu0 %v226_v1  ;;  %v263_v3 = vld [vmem:[%s515_s3 + $0x38] sm:$0xff]  ;;  %v262_v4 = vld [vmem:[%s515_s3 + $0x30] sm:$0xff]  ;;  %v261_v6 = vld [vmem:[%s515_s3 + $0x28] sm:$0xff]  ;;  %s384_s10 = sshll.u32 %s519_s21, 3  ;;  %v414_v20 = vmov 64.0   ;;  %vm324_vm6 = vcmask 7168  }
   0xf   : > { %276 = vmatpush.msra.mxu1 %v263_v3  ;;  %v223_v7 = vld [vmem:[%s513_s1] sm:$0xff]  ;;  %s217_s13 = scalar_lea.vmem %s512_s0, %s384_s10  ;;  %v259_v10 = vld [vmem:[%s515_s3 + $0x18] sm:$0xff]  ;;  %v258_v11 = vld [vmem:[%s515_s3 + $0x10] sm:$0xff]  ;;  %402 = vrcp.f32 %v414_v20  ;;  %s221_s30 = scalar_lea.vmem %s517_s5, %s384_s10 }
  0x10   : > { %248 = vmatpush.msra.mxu0 %v225_v2  ;;  %v260_v8 = vld [vmem:[%s515_s3 + $0x20] sm:$0xff]  ;;  %v257_v12 = vld [vmem:[%s515_s3 + $0x8] sm:$0xff] }
  0x11   : > { %277 = vmatpush.msra.mxu1 %v262_v4  ;;  %v222_v9 = vld [vmem:[%s217_s13] sm:$0xff] }
  0x12   : > { %249 = vmatpush.msra.mxu0 %v224_v5  ;;  %v256_v13 = vld [vmem:[%s515_s3] sm:$0xff] }
  0x13   : > { %278 = vmatpush.msra.mxu1 %v261_v6  ;;  %v400_v14 = vld [vmem:[%s514_s2] ss:$0 sm:$0xff] }
  0x14   : > { %250 = vmatpush.msra.mxu0 %v223_v7  ;;  %v401_v41 = vld [vmem:[#allocation2] ss:$0 sm:$0xff] }
  0x15   : > { %386 = vmatmul.msk.f32.vlgmr.msra.gmra.mxu0 %vm231_vm0, %v222_v9  ;;  %279 = vmatpush.msra.mxu1 %v260_v8  ;;  %v403_v21 = vpop.eup %402 }
  0x16   : > { %v293_v22 = vmul.f32 64.0, %v403_v21  ;;  %vm297_vm2 = vweird.f32 %v403_v21 }
  0x17   : > { %280 = vmatpush.msra.mxu1 %v259_v10 }
  0x18   : > { %v294_v23 = vsub.f32 1.0, %v293_v22 }
  0x19   : > { %281 = vmatpush.msra.mxu1 %v258_v11 }
  0x1a   : > { %v295_v24 = vmul.f32 %v403_v21, %v294_v23 }
  0x1b   : > { %282 = vmatpush.msra.mxu1 %v257_v12 }
  0x1c   : > { %v296_v25 = vadd.f32 %v403_v21, %v295_v24 }
  0x1d   : > { %283 = vmatpush.msra.mxu1 %v256_v13 }
  0x1e   : > { %v298_v26 = vsel %vm297_vm2, %v403_v21, %v296_v25 }
  0x92   : > { %v252_v15 = vpop.f32.mrf.mxu0 }
  0x93   : > { %v253_v16 = vadd.f32 %v400_v14, %v252_v15 }
  0x95   : > { %v255_v17 = vmax.f32 %v253_v16, 0.0 }
  0x97   : > { %387 = vmatmul.msk.f32.vlgmr.msra.gmra.mxu1 %vm264_vm1, %v255_v17  ;;  %v288_v18 = vmul.f32 %v255_v17, %v255_v17 }
  0x99   : > { %v289_v19 = vsel %vm264_vm1, %v288_v18, 0.0 }
  0x9a   : > { %290 = vadd.xlane.f32.xlu0 %v289_v19 }
 0x10d   : > { %v291_v27 = vpop.xlane.xlu0 %290 }
 0x10e   : > { %v299_v29 = vmul.f32 %v298_v26, %v291_v27 }
 0x114   : > { %v285_v28 = vpop.f32.mrf.mxu1 }
 0x115   : > { %v300_v30 = vmul.f32 %v285_v28, %v285_v28 }
 0x117   : > { %v301_v31 = vsub.f32 %v299_v29, %v300_v30 }
 0x119   : > { %v302_v32 = vmax.f32 %v301_v31, 0.0 }
 0x11b   : > { %v303_v33 = vadd.f32 1e-12, %v302_v32 }
 0x11d   : > { %404 = vrsqrt.f32 %v303_v33  ;;  %vm310_vm4 = vweird.f32 %v303_v33 }
 0x123   : > { %v405_v34 = vpop.eup %404 }
 0x124   : > { %v305_v35 = vmul.f32 %v405_v34, %v303_v33  ;;  %vm311_vm3 = vweird.f32 %v405_v34 }
 0x125   : > { %vm312_vm5 = vmor %vm310_vm4, %vm311_vm3 }
 0x126   : > { %v306_v36 = vmul.f32 %v405_v34, %v305_v35 }
 0x128   : > { %v307_v37 = vmul.f32 0.5, %v306_v36 }
 0x12a   : > { %v308_v38 = vsub.f32 1.5, %v307_v37 }
 0x12c   : > { %v309_v39 = vmul.f32 %v405_v34, %v308_v38 }
 0x12e   : > { %v313_v40 = vsel %vm312_vm5, %v405_v34, %v309_v39 }
 0x12f   : > { %315 = vrot.lane.b32.xlu0 %v313_v40, %s415_s27 }
 0x1a1   : > { %v316_v42 = vpop.permute.xlu0 %315 }
 0x1a2   : > { %v318_v43 = vmul.f32 %v316_v42, %v285_v28 }
 0x1a4   : > { %v323_v44 = vadd.f32 %v401_v41, %v318_v43 }
 0x1a6   : > { %325 = vst.msk [vmem:[%s221_s30] sm:$0xff] %vm324_vm6, %v323_v44 }
 0x1a7 PF: > { %s17_s20 = sadd.s32 1, %s412_s20  }
 0x1a8   : > { %p14_p4 = scmp.ge.s32.totalorder %s17_s20, 4  }
 0x1aa   :  { %16 = sbr.rel (!%p14_p4) target bundleno = 3 (0x3), region = 70 }

</bundles_post_ra>
